<compile_context>
chip_gen: v5e
topology: v5e:2x2
jax: 0.10.0
libtpu: 0.0.40
codegen_flags: <defaults>
</compile_context>

<pallas_src>
import functools
import random

import jax
import jax.numpy as jnp
from jax.experimental import pallas as pl
from jax.experimental.pallas import tpu as pltpu


def _round_up(x, m):
    return (x + m - 1) // m * m


def dynamicnet_kernel(x_ref, w_in_ref, w_mid_ref, w_out_ref, b_ref, o_ref,
                      *, n_mid, h_pad, d_out_pad):
    tile_n = x_ref.shape[0]

    # Hoist bias loads + broadcasts out of the unrolled loop (single packed tile).
    b_all = b_ref[...]                                        # (8, L) f32
    b_in = jnp.broadcast_to(b_all[0:1, :h_pad], (tile_n, h_pad))
    b_mid = jnp.broadcast_to(b_all[1:2, :h_pad], (tile_n, h_pad))
    b_out = jnp.broadcast_to(b_all[2:3, :d_out_pad], (tile_n, d_out_pad))

    # Input layer + ReLU: bf16 MXU operands, f32 accumulation, f32 elementwise.
    h = jnp.dot(x_ref[...], w_in_ref[...], preferred_element_type=jnp.float32)
    h = jnp.maximum(h + b_in, 0.0)

    # Dynamic number of middle-layer applications (weight reuse, like the PyTorch module).
    w_mid = w_mid_ref[...]                                    # loaded once, reused n_mid times
    for _ in range(n_mid):
        h = jnp.dot(h.astype(jnp.bfloat16), w_mid, preferred_element_type=jnp.float32)
        h = jnp.maximum(h + b_mid, 0.0)

    # Output layer (no activation); lane-dense (tile_n, d_out_pad) store.
    y = jnp.dot(h.astype(jnp.bfloat16), w_out_ref[...],
                preferred_element_type=jnp.float32) + b_out
    o_ref[...] = y.astype(o_ref.dtype)


def dynamicnet_forward(x, params, n_mid, tile_n=256):
    """x: (N, D_in) f32. params: dict of (in, out) weights / (1, out) biases. n_mid: static int."""
    w_in, b_in = params["w_in"], params["b_in"]
    w_mid, b_mid = params["w_mid"], params["b_mid"]
    w_out, b_out = params["w_out"], params["b_out"]
    N, D_in = x.shape
    H = w_in.shape[1]
    D_out = w_out.shape[1]

    # Lane-dense padded dims (multiples of 128); batch padded to the tile size.
    D_in_p = _round_up(D_in, 128)
    H_p = _round_up(H, 128)
    D_out_p = _round_up(D_out, 128)
    L = max(H_p, D_out_p)
    TILE_N = tile_n if N >= tile_n else _round_up(N, 8)
    N_p = _round_up(N, TILE_N)

    # Zero-pad and cast matmul operands to bf16 (f32 accumulation happens in-kernel).
    x_p = jnp.zeros((N_p, D_in_p), jnp.bfloat16).at[:N, :D_in].set(x.astype(jnp.bfloat16))
    w_in_p = jnp.zeros((D_in_p, H_p), jnp.bfloat16).at[:D_in, :H].set(w_in.astype(jnp.bfloat16))
    w_mid_p = jnp.zeros((H_p, H_p), jnp.bfloat16).at[:H, :H].set(w_mid.astype(jnp.bfloat16))
    w_out_p = jnp.zeros((H_p, D_out_p), jnp.bfloat16).at[:H, :D_out].set(w_out.astype(jnp.bfloat16))

    # Pack the three biases into one (8, L) tile-aligned f32 buffer -> a single DMA.
    b_all = jnp.zeros((8, L), jnp.float32)
    b_all = b_all.at[0, :H].set(b_in.reshape(-1))
    b_all = b_all.at[1, :H].set(b_mid.reshape(-1))
    b_all = b_all.at[2, :D_out].set(b_out.reshape(-1))

    grid = (N_p // TILE_N,)
    out_p = pl.pallas_call(
        functools.partial(dynamicnet_kernel, n_mid=n_mid, h_pad=H_p, d_out_pad=D_out_p),
        out_shape=jax.ShapeDtypeStruct((N_p, D_out_p), jnp.float32),
        grid=grid,
        in_specs=[
            pl.BlockSpec((TILE_N, D_in_p), lambda i: (i, 0)),   # x: tiled over batch
            pl.BlockSpec((D_in_p, H_p), lambda i: (0, 0)),      # weights: full / resident
            pl.BlockSpec((H_p, H_p), lambda i: (0, 0)),
            pl.BlockSpec((H_p, D_out_p), lambda i: (0, 0)),
            pl.BlockSpec((8, L), lambda i: (0, 0)),             # packed biases: one tile
        ],
        out_specs=pl.BlockSpec((TILE_N, D_out_p), lambda i: (i, 0)),
        compiler_params=pltpu.CompilerParams(
            dimension_semantics=("parallel",),
            vmem_limit_bytes=32 << 20,
        ),
    )(x_p, w_in_p, w_mid_p, w_out_p, b_all)

    # Slice the lane-dense slab back to the logical output shape.
    return out_p[:N, :D_out]


def init_params(key, D_in, H, D_out):
    """Deterministic init mimicking nn.Linear's U(-1/sqrt(fan_in), 1/sqrt(fan_in))."""
    ks = jax.random.split(key, 6)

    def lin(kw, kb, fan_in, fan_out):
        bound = 1.0 / jnp.sqrt(fan_in)
        w = jax.random.uniform(kw, (fan_in, fan_out), jnp.float32, -bound, bound)
        b = jax.random.uniform(kb, (1, fan_out), jnp.float32, -bound, bound)
        return w, b

    w_in, b_in = lin(ks[0], ks[1], D_in, H)
    w_mid, b_mid = lin(ks[2], ks[3], H, H)
    w_out, b_out = lin(ks[4], ks[5], H, D_out)
    return dict(w_in=w_in, b_in=b_in, w_mid=w_mid, b_mid=b_mid,
                w_out=w_out, b_out=b_out)


if __name__ == "__main__":
    N, D_in, H, D_out = 8, 16, 32, 8

    key = jax.random.PRNGKey(0)
    kx, kp = jax.random.split(key)
    x = jax.random.normal(kx, (N, D_in), jnp.float32)
    params = init_params(kp, D_in, H, D_out)

    # Mirror the Python-level dynamic graph: number of middle-layer passes is chosen
    # by a seeded Python RNG and baked in as a static unroll count inside the kernel.
    random.seed(0)
    n_mid = random.randint(0, 3)

    y = dynamicnet_forward(x, params, n_mid)
    jax.block_until_ready(y)

    # Sanity check against a pure-JAX reference using the same bf16-operand /
    # f32-accumulation numerics as the kernel.
    xb = x.astype(jnp.bfloat16)
    w_in_b = params["w_in"].astype(jnp.bfloat16)
    w_mid_b = params["w_mid"].astype(jnp.bfloat16)
    w_out_b = params["w_out"].astype(jnp.bfloat16)
    h = jnp.maximum(jnp.dot(xb, w_in_b, preferred_element_type=jnp.float32)
                    + params["b_in"], 0.0)
    for _ in range(n_mid):
        h = jnp.maximum(jnp.dot(h.astype(jnp.bfloat16), w_mid_b,
                                preferred_element_type=jnp.float32)
                        + params["b_mid"], 0.0)
    y_ref = jnp.dot(h.astype(jnp.bfloat16), w_out_b,
                    preferred_element_type=jnp.float32) + params["b_out"]
    assert y.shape == (N, D_out)
    assert jnp.allclose(y, y_ref, atol=1e-3, rtol=1e-3), float(jnp.max(jnp.abs(y - y_ref)))

    print("KERNEL_OK")
</pallas_src>

<mosaic_0001>
module attributes {stable_mosaic.version = 11 : i64} {
  func.func @dynamicnet_kernel(%arg0: i32, %arg1: memref<8x128xbf16, #tpu.memory_space<vmem>>, %arg2: memref<128x128xbf16, #tpu.memory_space<vmem>>, %arg3: memref<128x128xbf16, #tpu.memory_space<vmem>>, %arg4: memref<128x128xbf16, #tpu.memory_space<vmem>>, %arg5: memref<8x128xf32, #tpu.memory_space<vmem>>, %arg6: memref<8x128xf32, #tpu.memory_space<vmem>>) attributes {dimension_semantics = [#tpu.dimension_semantics<parallel>], iteration_bounds = array<i64: 1>, scalar_prefetch = 0 : i64, scratch_operands = 0 : i64, tpu.core_type = #tpu.core_type<tc>, window_params = [{transform_indices = @transform_0, window_bounds = array<i64: 8, 128>}, {pipeline_mode = #tpu.pipeline_mode<synchronous>, transform_indices = @transform_1, window_bounds = array<i64: 128, 128>}, {pipeline_mode = #tpu.pipeline_mode<synchronous>, transform_indices = @transform_2, window_bounds = array<i64: 128, 128>}, {pipeline_mode = #tpu.pipeline_mode<synchronous>, transform_indices = @transform_3, window_bounds = array<i64: 128, 128>}, {pipeline_mode = #tpu.pipeline_mode<synchronous>, transform_indices = @transform_4, window_bounds = array<i64: 8, 128>}, {transform_indices = @transform_5, window_bounds = array<i64: 8, 128>}]} {
    %c0 = arith.constant 0 : index
    %c0_0 = arith.constant 0 : index
    %0 = vector.load %arg5[%c0, %c0_0] : memref<8x128xf32, #tpu.memory_space<vmem>>, vector<8x128xf32>
    %1 = vector.extract_strided_slice %0 {offsets = [0, 0], sizes = [1, 128], strides = [1, 1]} : vector<8x128xf32> to vector<1x128xf32>
    %2 = vector.shape_cast %1 : vector<1x128xf32> to vector<1x128xf32>
    %3 = vector.broadcast %2 : vector<1x128xf32> to vector<8x128xf32>
    %4 = vector.extract_strided_slice %0 {offsets = [1, 0], sizes = [1, 128], strides = [1, 1]} : vector<8x128xf32> to vector<1x128xf32>
    %5 = vector.shape_cast %4 : vector<1x128xf32> to vector<1x128xf32>
    %6 = vector.broadcast %5 : vector<1x128xf32> to vector<8x128xf32>
    %7 = vector.extract_strided_slice %0 {offsets = [2, 0], sizes = [1, 128], strides = [1, 1]} : vector<8x128xf32> to vector<1x128xf32>
    %8 = vector.shape_cast %7 : vector<1x128xf32> to vector<1x128xf32>
    %9 = vector.broadcast %8 : vector<1x128xf32> to vector<8x128xf32>
    %c0_1 = arith.constant 0 : index
    %c0_2 = arith.constant 0 : index
    %10 = vector.load %arg1[%c0_1, %c0_2] : memref<8x128xbf16, #tpu.memory_space<vmem>>, vector<8x128xbf16>
    %c0_3 = arith.constant 0 : index
    %c0_4 = arith.constant 0 : index
    %11 = vector.load %arg2[%c0_3, %c0_4] : memref<128x128xbf16, #tpu.memory_space<vmem>>, vector<128x128xbf16>
    %cst = arith.constant dense<0.000000e+00> : vector<8x128xf32>
    %12 = tpu.matmul %10, %11, %cst {dimension_numbers = #tpu.dot_dimension_numbers<[1], [0], [0], [1], [0, 0, 1, 1], [], []>} : vector<8x128xbf16>, vector<128x128xbf16>, vector<8x128xf32> -> vector<8x128xf32>
    %13 = arith.addf %12, %3 : vector<8x128xf32>
    %cst_5 = arith.constant 0.000000e+00 : f32
    %14 = vector.broadcast %cst_5 : f32 to vector<8x128xf32>
    %15 = arith.maximumf %13, %14 : vector<8x128xf32>
    %c0_6 = arith.constant 0 : index
    %c0_7 = arith.constant 0 : index
    %16 = vector.load %arg3[%c0_6, %c0_7] : memref<128x128xbf16, #tpu.memory_space<vmem>>, vector<128x128xbf16>
    %17 = arith.truncf %15 : vector<8x128xf32> to vector<8x128xbf16>
    %cst_8 = arith.constant dense<0.000000e+00> : vector<8x128xf32>
    %18 = tpu.matmul %17, %16, %cst_8 {dimension_numbers = #tpu.dot_dimension_numbers<[1], [0], [0], [1], [0, 0, 1, 1], [], []>} : vector<8x128xbf16>, vector<128x128xbf16>, vector<8x128xf32> -> vector<8x128xf32>
    %19 = arith.addf %18, %6 : vector<8x128xf32>
    %cst_9 = arith.constant 0.000000e+00 : f32
    %20 = vector.broadcast %cst_9 : f32 to vector<8x128xf32>
    %21 = arith.maximumf %19, %20 : vector<8x128xf32>
    %22 = arith.truncf %21 : vector<8x128xf32> to vector<8x128xbf16>
    %cst_10 = arith.constant dense<0.000000e+00> : vector<8x128xf32>
    %23 = tpu.matmul %22, %16, %cst_10 {dimension_numbers = #tpu.dot_dimension_numbers<[1], [0], [0], [1], [0, 0, 1, 1], [], []>} : vector<8x128xbf16>, vector<128x128xbf16>, vector<8x128xf32> -> vector<8x128xf32>
    %24 = arith.addf %23, %6 : vector<8x128xf32>
    %cst_11 = arith.constant 0.000000e+00 : f32
    %25 = vector.broadcast %cst_11 : f32 to vector<8x128xf32>
    %26 = arith.maximumf %24, %25 : vector<8x128xf32>
    %27 = arith.truncf %26 : vector<8x128xf32> to vector<8x128xbf16>
    %cst_12 = arith.constant dense<0.000000e+00> : vector<8x128xf32>
    %28 = tpu.matmul %27, %16, %cst_12 {dimension_numbers = #tpu.dot_dimension_numbers<[1], [0], [0], [1], [0, 0, 1, 1], [], []>} : vector<8x128xbf16>, vector<128x128xbf16>, vector<8x128xf32> -> vector<8x128xf32>
    %29 = arith.addf %28, %6 : vector<8x128xf32>
    %cst_13 = arith.constant 0.000000e+00 : f32
    %30 = vector.broadcast %cst_13 : f32 to vector<8x128xf32>
    %31 = arith.maximumf %29, %30 : vector<8x128xf32>
    %32 = arith.truncf %31 : vector<8x128xf32> to vector<8x128xbf16>
    %c0_14 = arith.constant 0 : index
    %c0_15 = arith.constant 0 : index
    %33 = vector.load %arg4[%c0_14, %c0_15] : memref<128x128xbf16, #tpu.memory_space<vmem>>, vector<128x128xbf16>
    %cst_16 = arith.constant dense<0.000000e+00> : vector<8x128xf32>
    %34 = tpu.matmul %32, %33, %cst_16 {dimension_numbers = #tpu.dot_dimension_numbers<[1], [0], [0], [1], [0, 0, 1, 1], [], []>} : vector<8x128xbf16>, vector<128x128xbf16>, vector<8x128xf32> -> vector<8x128xf32>
    %35 = arith.addf %34, %9 : vector<8x128xf32>
    %c0_17 = arith.constant 0 : index
    %c0_18 = arith.constant 0 : index
    %36 = vector.load %arg6[%c0_17, %c0_18] : memref<8x128xf32, #tpu.memory_space<vmem>>, vector<8x128xf32>
    tpu.vector_store %arg6[%c0_17, %c0_18], %35 {strides = array<i32>} : memref<8x128xf32, #tpu.memory_space<vmem>>, vector<8x128xf32>,
    return
  }
  func.func @transform_0(%arg0: i32) -> (i32, i32) {
    %c0_i32 = arith.constant 0 : i32
    %c0_i32_0 = arith.constant 0 : i32
    return %arg0, %c0_i32 : i32, i32
  }
  func.func @transform_1(%arg0: i32) -> (i32, i32) {
    %c0_i32 = arith.constant 0 : i32
    %c0_i32_0 = arith.constant 0 : i32
    %c0_i32_1 = arith.constant 0 : i32
    return %c0_i32, %c0_i32_0 : i32, i32
  }
  func.func @transform_2(%arg0: i32) -> (i32, i32) {
    %c0_i32 = arith.constant 0 : i32
    %c0_i32_0 = arith.constant 0 : i32
    %c0_i32_1 = arith.constant 0 : i32
    return %c0_i32, %c0_i32_0 : i32, i32
  }
  func.func @transform_3(%arg0: i32) -> (i32, i32) {
    %c0_i32 = arith.constant 0 : i32
    %c0_i32_0 = arith.constant 0 : i32
    %c0_i32_1 = arith.constant 0 : i32
    return %c0_i32, %c0_i32_0 : i32, i32
  }
  func.func @transform_4(%arg0: i32) -> (i32, i32) {
    %c0_i32 = arith.constant 0 : i32
    %c0_i32_0 = arith.constant 0 : i32
    %c0_i32_1 = arith.constant 0 : i32
    return %c0_i32, %c0_i32_0 : i32, i32
  }
  func.func @transform_5(%arg0: i32) -> (i32, i32) {
    %c0_i32 = arith.constant 0 : i32
    %c0_i32_0 = arith.constant 0 : i32
    return %arg0, %c0_i32 : i32, i32
  }
}

</mosaic_0001>

<bundles_post_ra>
// kernel: tpu_custom_call.1
= control target key start
LH: loop header
LB: loop body
LE: loop exit
PB: predicated region body
PF: predicated region fallthrough
CT: control target
= control target key end

     0   :  { %10 = vsyncpa [#allocation3], 0  ;;  %s721_s0 = inlined_call_operand.hbm [shape: bf16[8,128], index: 0, kind: input, shape index: {}]   ;;  %s722_s1 = inlined_call_operand.hbm [shape: bf16[128,128], index: 1, kind: input, shape index: {}]   ;;  %s723_s2 = inlined_call_operand.hbm [shape: bf16[128,128], index: 2, kind: input, shape index: {}]   ;;  %s724_s3 = inlined_call_operand.hbm [shape: bf16[128,128], index: 3, kind: input, shape index: {}]   ;;  %s725_s4 = inlined_call_operand.hbm [shape: f32[8,128], index: 4, kind: input, shape index: {}]   ;;  %s726_s5 = inlined_call_operand.hbm [shape: f32[8,128], index: 5, kind: output, shape index: {}]  }
   0x1   :  { %11 = vsyncpa [#allocation6], 0 }
   0x2   :  { %12 = vsyncpa [#allocation9], 0  ;;  %s29_s20 = sshll.u32 %s722_s1, 4  ;;  %s30_s20 = int_to_ptr.hbm [resolvable:$true] %s29_s20 }
   0x3   :  { %13 = vsyncpa [#allocation4], 0  ;;  %s665_s21 = smov [#allocation5]   ;;  %s55_s25 = sshll.u32 %s724_s3, 4  ;;  %s56_s25 = int_to_ptr.hbm [resolvable:$true] %s55_s25 }
   0x4   :  { %s31_s22 = sshll.u32 %s665_s21, 4  ;;  %s666_s26 = smov 64   ;;  %s32_s22 = int_to_ptr.vmem [resolvable:$true] %s31_s22 }
   0x5   :  { %s667_s27 = smov 4   ;;  %s668_s28 = smov [#allocation8]  }
   0x6   :  { %37 = dma.hbm_to_vmem [thread:$0]  %s30_s20, 1024, %s32_s22, [#allocation6], %s666_s26, %s666_s26, %s667_s27  }
   0x7   :  { %s57_s29 = sshll.u32 %s668_s28, 4  ;;  %s19_s7 = sshll.u32 %s721_s0, 4  ;;  %s58_s29 = int_to_ptr.vmem [resolvable:$true] %s57_s29  ;;  %s20_s7 = int_to_ptr.hbm [resolvable:$true] %s19_s7 }
   0x8   :  { %63 = dma.hbm_to_vmem [thread:$0]  %s56_s25, 1024, %s58_s29, [#allocation9], %s666_s26, %s666_s26, %s667_s27  }
   0x9   :  { %s42_s9 = sshll.u32 %s723_s2, 4  ;;  %s669_s10 = smov [#allocation2]   ;;  %s43_s9 = int_to_ptr.hbm [resolvable:$true] %s42_s9 }
   0xa   :  { %s21_s11 = sshll.u32 %s669_s10, 4  ;;  %s670_s3 = smov [#allocation7]   ;;  %s22_s11 = int_to_ptr.vmem [resolvable:$true] %s21_s11 }
   0xb   :  { %24 = dma.hbm_to_vmem [thread:$0]  %s20_s7, 64, %s22_s11, [#allocation3]  }
   0xc   :  { %s44_s12 = sshll.u32 %s670_s3, 4  ;;  %s69_s15 = sshll.u32 %s725_s4, 4  ;;  %s45_s12 = int_to_ptr.vmem [resolvable:$true] %s44_s12  ;;  %s70_s15 = int_to_ptr.hbm [resolvable:$true] %s69_s15 }
   0xd   :  { %50 = dma.hbm_to_vmem [thread:$0]  %s43_s9, 1024, %s45_s12, [#allocation6], %s666_s26, %s666_s26, %s667_s27  }
   0xe   :  { %s671_s0 = smov [#allocation10]  }
   0xf   :  { %s71_s16 = sshll.u32 %s671_s0, 4  ;;  %s72_s16 = int_to_ptr.vmem [resolvable:$true] %s71_s16 }
  0x10   :  { %74 = dma.hbm_to_vmem [thread:$0]  %s70_s15, 128, %s72_s16, [#allocation9]  }
  0x11   :  { %657 = dma.done.wait [#allocation3], 64  }
  0x12   :  { %658 = vsyncadd [#allocation3], 4294967232 }
  0x13   :  { %659 = dma.done.wait [#allocation6], 2048  }
  0x14   :  { %660 = vsyncadd [#allocation6], 4294965248 }
  0x15   :  { %661 = dma.done.wait [#allocation9], 1152  }
  0x16   :  { %662 = vsyncadd [#allocation9], 4294966144  ;;  %v488_v0 = vld [vmem:[#allocation5 + $0x38] sm:$0xff]  ;;  %v487_v1 = vld [vmem:[#allocation5 + $0x30] sm:$0xff]  ;;  %s672_s2 = smov [#allocation11]   ;;  %s373_s19 = sshll.u32 %s726_s5, 4  ;;  %s374_s19 = int_to_ptr.hbm [resolvable:$true] %s373_s19 }
  0x17   :  { %164 = vmatpush.bf16.msra.mxu0 %v488_v0  ;;  %v496_v2 = vld [vmem:[#allocation7 + $0x38] sm:$0xff]  ;;  %v495_v3 = vld [vmem:[#allocation7 + $0x30] sm:$0xff]  ;;  %v486_v4 = vld [vmem:[#allocation5 + $0x28] sm:$0xff]  ;;  %s371_s4 = sshll.u32 %s672_s2, 4  ;;  %s372_s4 = int_to_ptr.vmem [resolvable:$true] %s371_s4 }
  0x18   :  { %243 = vmatpush.bf16.msra.mxu1 %v496_v2  ;;  %258 = vmatpush.bf16.msra.mxu2 %v496_v2  ;;  %v494_v5 = vld [vmem:[#allocation7 + $0x28] sm:$0xff]  ;;  %v485_v6 = vld [vmem:[#allocation5 + $0x20] sm:$0xff]  ;;  %v484_v8 = vld [vmem:[#allocation5 + $0x18] sm:$0xff] }
  0x19   :  { %273 = vmatpush.bf16.msra.mxu3 %v496_v2  ;;  %v493_v7 = vld [vmem:[#allocation7 + $0x20] sm:$0xff]  ;;  %v492_v9 = vld [vmem:[#allocation7 + $0x18] sm:$0xff]  ;;  %v483_v10 = vld [vmem:[#allocation5 + $0x10] sm:$0xff] }
  0x1a   :  { %v491_v11 = vld [vmem:[#allocation7 + $0x10] sm:$0xff]  ;;  %v482_v12 = vld [vmem:[#allocation5 + $0x8] sm:$0xff]  ;;  %v481_v13 = vld [vmem:[#allocation5] sm:$0xff] }
  0x1b   :  { %165 = vmatpush.bf16.msra.mxu0 %v487_v1  ;;  %v99_v14 = vld [vmem:[#allocation2] sm:$0xf]  ;;  %v490_v15 = vld [vmem:[#allocation7 + $0x8] sm:$0xff]  ;;  %v489_v16 = vld [vmem:[#allocation7] sm:$0xff] }
  0x1c   :  { %244 = vmatpush.bf16.msra.mxu1 %v495_v3  ;;  %259 = vmatpush.bf16.msra.mxu2 %v495_v3  ;;  %v95_v17 = vld [vmem:[#allocation10] sm:$0xff]  ;;  %v504_v30 = vld [vmem:[#allocation8 + $0x38] sm:$0xff]  ;;  %v503_v31 = vld [vmem:[#allocation8 + $0x30] sm:$0xff] }
  0x1d   :  { %274 = vmatpush.bf16.msra.mxu3 %v495_v3  ;;  %v96_v18 = vperm.slane %v95_v17, 0  ;;  %v97_v24 = vperm.slane %v95_v17, 1  ;;  %v502_v32 = vld [vmem:[#allocation8 + $0x28] sm:$0xff]  ;;  %v501_v33 = vld [vmem:[#allocation8 + $0x20] sm:$0xff]  ;;  %v500_v34 = vld [vmem:[#allocation8 + $0x18] sm:$0xff]  ;;  %v98_v48 = vperm.slane %v95_v17, 2 }
  0x1e   :  { %v499_v35 = vld [vmem:[#allocation8 + $0x10] sm:$0xff]  ;;  %v498_v41 = vld [vmem:[#allocation8 + $0x8] sm:$0xff]  ;;  %v497_v42 = vld [vmem:[#allocation8] sm:$0xff] }
  0x1f   :  { %166 = vmatpush.bf16.msra.mxu0 %v486_v4 }
  0x20   :  { %245 = vmatpush.bf16.msra.mxu1 %v494_v5  ;;  %260 = vmatpush.bf16.msra.mxu2 %v494_v5 }
  0x21   :  { %275 = vmatpush.bf16.msra.mxu3 %v494_v5 }
  0x23   :  { %167 = vmatpush.bf16.msra.mxu0 %v485_v6 }
  0x24   :  { %246 = vmatpush.bf16.msra.mxu1 %v493_v7  ;;  %261 = vmatpush.bf16.msra.mxu2 %v493_v7 }
  0x25   :  { %276 = vmatpush.bf16.msra.mxu3 %v493_v7 }
  0x27   :  { %168 = vmatpush.bf16.msra.mxu0 %v484_v8 }
  0x28   :  { %247 = vmatpush.bf16.msra.mxu1 %v492_v9  ;;  %262 = vmatpush.bf16.msra.mxu2 %v492_v9 }
  0x29   :  { %277 = vmatpush.bf16.msra.mxu3 %v492_v9 }
  0x2b   :  { %169 = vmatpush.bf16.msra.mxu0 %v483_v10 }
  0x2c   :  { %248 = vmatpush.bf16.msra.mxu1 %v491_v11  ;;  %263 = vmatpush.bf16.msra.mxu2 %v491_v11 }
  0x2d   :  { %278 = vmatpush.bf16.msra.mxu3 %v491_v11 }
  0x2f   :  { %170 = vmatpush.bf16.msra.mxu0 %v482_v12 }
  0x30   :  { %249 = vmatpush.bf16.msra.mxu1 %v490_v15  ;;  %264 = vmatpush.bf16.msra.mxu2 %v490_v15 }
  0x31   :  { %279 = vmatpush.bf16.msra.mxu3 %v490_v15 }
  0x33   :  { %171 = vmatpush.bf16.msra.mxu0 %v481_v13 }
  0x34   :  { %250 = vmatpush.bf16.msra.mxu1 %v489_v16  ;;  %265 = vmatpush.bf16.msra.mxu2 %v489_v16 }
  0x35   :  { %280 = vmatpush.bf16.msra.mxu3 %v489_v16 }
  0x36   :  { %172 = vmatmul.bf16.vlgmr.msra.gmra.mxu0 %v99_v14 }
  0x37   :  { %352 = vmatpush.bf16.msrb.mxu0 %v504_v30 }
  0x3b   :  { %353 = vmatpush.bf16.msrb.mxu0 %v503_v31 }
  0x3f   :  { %354 = vmatpush.bf16.msrb.mxu0 %v502_v32 }
  0x43   :  { %355 = vmatpush.bf16.msrb.mxu0 %v501_v33 }
  0x47   :  { %356 = vmatpush.bf16.msrb.mxu0 %v500_v34 }
  0x4b   :  { %357 = vmatpush.bf16.msrb.mxu0 %v499_v35 }
  0x4f   :  { %358 = vmatpush.bf16.msrb.mxu0 %v498_v41 }
  0x53   :  { %359 = vmatpush.bf16.msrb.mxu0 %v497_v42 }
  0xb3   :  { %v173_v19 = vpop.f32.mrf.mxu0 }
  0xb4   :  { %v174_v20 = vadd.f32 %v173_v19, %v96_v18 }
  0xb6   :  { %v177_v21 = vmax.f32 %v174_v20, 0.0 }
  0xb8   :  { %v194_v22 = vpack.c.bf16 %v177_v21, %v177_v21 }
  0xba   :  { %251 = vmatmul.bf16.vlgmr.msra.gmra.mxu1 %v194_v22 }
  0xbb   :  { %v175_v23 = vpop.f32.mrf.mxu0 }
 0x137   :  { %v252_v25 = vpop.f32.mrf.mxu1 }
 0x138   :  { %v253_v26 = vadd.f32 %v252_v25, %v97_v24 }
 0x13a   :  { %v256_v27 = vmax.f32 %v253_v26, 0.0 }
 0x13c   :  { %v257_v28 = vpack.c.bf16 %v256_v27, %v256_v27 }
 0x13e   :  { %266 = vmatmul.bf16.vlgmr.msra.gmra.mxu2 %v257_v28 }
 0x13f   :  { %v254_v29 = vpop.f32.mrf.mxu1 }
 0x1c1   :  { %v267_v36 = vpop.f32.mrf.mxu2 }
 0x1c2   :  { %v268_v37 = vadd.f32 %v267_v36, %v97_v24 }
 0x1c4   :  { %v271_v38 = vmax.f32 %v268_v37, 0.0 }
 0x1c6   :  { %v272_v39 = vpack.c.bf16 %v271_v38, %v271_v38 }
 0x1c8   :  { %281 = vmatmul.bf16.vlgmr.msra.gmra.mxu3 %v272_v39 }
 0x1c9   :  { %v269_v40 = vpop.f32.mrf.mxu2 }
 0x24b   :  { %v282_v43 = vpop.f32.mrf.mxu3 }
 0x24c   :  { %v283_v44 = vadd.f32 %v282_v43, %v97_v24 }
 0x24e   :  { %v286_v45 = vmax.f32 %v283_v44, 0.0 }
 0x250   :  { %v287_v46 = vpack.c.bf16 %v286_v45, %v286_v45 }
 0x252   :  { %360 = vmatmul.bf16.vlgmr.msrb.gmra.mxu0 %v287_v46 }
 0x253   :  { %v284_v47 = vpop.f32.mrf.mxu3 }
 0x2cf   :  { %v361_v49 = vpop.f32.mrf.mxu0 }
 0x2d0   :  { %v362_v50 = vadd.f32 %v361_v49, %v98_v48 }
 0x2d2   :  { %365 = vst [vmem:[#allocation11] sm:$0xff] %v362_v50 }
 0x2d3   :  { %376 = dma.vmem_to_hbm [thread:$0]  %s372_s4, 128, %s374_s19, [#allocation4]  }
 0x2d7   :  { %v363_v51 = vpop.f32.mrf.mxu0 }
 0x2d8   :  { %663 = dma.done.wait [#allocation4], 128  }
 0x2d9   :  { %664 = vsyncadd [#allocation4], 4294967168 }
 0x2da   :  { %381 = vsyncpa [#allocation3], 1 }
 0x2db   :  { %382 = vsyncpa [#allocation6], 1 }
 0x2dc   :  { %383 = vsyncpa [#allocation9], 1 }
 0x2dd   :  { %384 = vsyncpa [#allocation4], 1 }

</bundles_post_ra>
